<compile_context>
chip_gen: v7x
topology: tpu7x:2x2x1
jax: 0.10.0
libtpu: 0.0.40
codegen_flags: <defaults>
</compile_context>

<pallas_src>
import numpy as np
import jax
import jax.numpy as jnp
from jax.experimental import pallas as pl
from jax.experimental.pallas import tpu as pltpu


def _round_up(a, b):
    return ((a + b - 1) // b) * b


# ----------------------------- Pallas kernel --------------------------------
def _ctx_kernel(feats_ref, pooled_ref, e_ref, wn_w_ref, wn_bd_ref, wn_b_ref,
                bw_ov_ref, bw_ft_ref, bn_b_ref, out_ref):
    """Per (image, pixel-tile) block, channels on sublanes / pixels on lanes:

         ms_all          = pooled_blockstack @ E          (all 4 upsampled scales)
         logits_i        = (W_wn f + b_wn) - (W_wn ms_i)  (batched block-diag dot)
         w_i             = sigmoid(logits_i)
         overall         = sum_i ms_i * w_i * recip(sum_i w_i)
         out             = relu(W_bn_ov overall + W_bn_ft f + b_bn)
    """
    f = feats_ref[0]                                   # (C, T)   lane-dense tile
    C = f.shape[0]
    pooled = pooled_ref[0]                             # (S*C, SPp) tiny, block-packed
    S = pooled.shape[0] // C
    e = e_ref[...]                                     # (SPp, T) bilinear expansion

    # Reconstruct all S bilinearly-upsampled multi-scale features for this
    # pixel tile in one small matmul (the 4xPxC ms_stack never touches HBM).
    ms_all = jnp.dot(pooled, e, preferred_element_type=jnp.float32)      # (S*C, T)

    # weight_net logits for all scales:  W(f - ms_i) + b == (Wf + b) - W ms_i
    wf = jnp.dot(wn_w_ref[...], f,
                 preferred_element_type=jnp.float32) + wn_b_ref[...]     # (C, T)
    wms = jnp.dot(wn_bd_ref[...], ms_all,
                  preferred_element_type=jnp.float32)                    # (S*C, T)

    num = jnp.zeros_like(f)
    den = jnp.zeros_like(f)
    for i in range(S):                                 # static unroll (4 scales)
        wi = jax.nn.sigmoid(wf - wms[i * C:(i + 1) * C, :])
        num = num + ms_all[i * C:(i + 1) * C, :] * wi
        den = den + wi
    overall = num * pl.reciprocal(den, approx=True)    # divide on the EUP

    # bottleneck 1x1 conv on concat([overall, feats]) == two half-matmuls
    z = (jnp.dot(bw_ov_ref[...], overall, preferred_element_type=jnp.float32)
         + jnp.dot(bw_ft_ref[...], f, preferred_element_type=jnp.float32)
         + bn_b_ref[...])                              # (OUT, T)
    out_ref[0] = jnp.maximum(z, 0.0).astype(out_ref.dtype)


def contextual_pallas(feats_cf, pooled_bs, e_all, wn_w, wn_bd, wn_b_col,
                      bw_overall, bw_feats, bn_b_col, *, tile):
    N, C, HWp = feats_cf.shape
    SC, SPp = pooled_bs.shape[1], pooled_bs.shape[2]
    OUT = bw_overall.shape[0]
    assert HWp % tile == 0 and tile % 128 == 0
    grid = (N, HWp // tile)
    return pl.pallas_call(
        _ctx_kernel,
        out_shape=jax.ShapeDtypeStruct((N, OUT, HWp), jnp.float32),
        grid_spec=pltpu.PrefetchScalarGridSpec(
            num_scalar_prefetch=0,
            grid=grid,
            in_specs=[
                pl.BlockSpec((1, C, tile), lambda n, t: (n, 0, t)),   # feats (lane-dense)
                pl.BlockSpec((1, SC, SPp), lambda n, t: (n, 0, 0)),   # pooled block-stack
                pl.BlockSpec((SPp, tile), lambda n, t: (0, t)),       # bilinear expansion E
                pl.BlockSpec((C, C), lambda n, t: (0, 0)),            # weight_net W
                pl.BlockSpec((SC, SC), lambda n, t: (0, 0)),          # weight_net W (block-diag)
                pl.BlockSpec((C, 1), lambda n, t: (0, 0)),            # weight_net bias
                pl.BlockSpec((OUT, C), lambda n, t: (0, 0)),          # bottleneck W (overall half)
                pl.BlockSpec((OUT, C), lambda n, t: (0, 0)),          # bottleneck W (feats half)
                pl.BlockSpec((OUT, 1), lambda n, t: (0, 0)),          # bottleneck bias
            ],
            out_specs=pl.BlockSpec((1, OUT, tile), lambda n, t: (n, 0, t)),
        ),
        compiler_params=pltpu.CompilerParams(
            dimension_semantics=("parallel", "parallel")),
    )(feats_cf, pooled_bs, e_all, wn_w, wn_bd, wn_b_col,
      bw_overall, bw_feats, bn_b_col)


# ------------------------------ JAX glue ------------------------------------
def adaptive_avg_pool_nchw(x, s):
    """Exact nn.AdaptiveAvgPool2d bin boundaries (floor/ceil) on NCHW."""
    N, C, H, W = x.shape
    rows = []
    for i in range(s):
        h0, h1 = (i * H) // s, ((i + 1) * H + s - 1) // s
        cols = []
        for j in range(s):
            w0, w1 = (j * W) // s, ((j + 1) * W + s - 1) // s
            cols.append(jnp.mean(x[:, :, h0:h1, w0:w1], axis=(2, 3)))   # (N, C)
        rows.append(jnp.stack(cols, axis=-1))                           # (N, C, s)
    return jnp.stack(rows, axis=-2)                                     # (N, C, s, s)


def upsample_matrix(in_size, out_size):
    """Bilinear interpolation matrix (align_corners=False), PyTorch semantics."""
    M = np.zeros((out_size, in_size), dtype=np.float32)
    scale = in_size / out_size
    for o in range(out_size):
        src = (o + 0.5) * scale - 0.5
        src = max(src, 0.0)
        i0 = min(int(np.floor(src)), in_size - 1)
        i1 = min(i0 + 1, in_size - 1)
        lam = src - i0
        M[o, i0] += 1.0 - lam
        M[o, i1] += lam
    return M


# ------------------------------- main ----------------------------------------
if __name__ == "__main__":
    key = jax.random.PRNGKey(0)
    N, C, H, W = 2, 8, 16, 16          # small "features" = 8
    OUT = 16                           # small "out_features"
    sizes = (1, 2, 3, 6)
    S = len(sizes)

    ks = jax.random.split(key, 8)
    x = jax.random.normal(ks[0], (N, C, H, W), dtype=jnp.float32)      # NCHW

    # Parameters matching _initialize_weights (normal std=0.01, bias=0).
    scale_ws = [0.01 * jax.random.normal(ks[1 + i], (C, C), dtype=jnp.float32)
                for i in range(S)]                                     # (out, in), no bias
    wn_w = 0.01 * jax.random.normal(ks[5], (C, C), dtype=jnp.float32)  # (out, in)
    wn_b = jnp.zeros((C,), jnp.float32)
    bn_w = 0.01 * jax.random.normal(ks[6], (OUT, 2 * C), dtype=jnp.float32)
    bn_b = jnp.zeros((OUT,), jnp.float32)

    # ---------------- wrapper glue (tiny work) -------------------------------
    HW = H * W
    MAX_TILE = 2048                            # cap keeps v7x (64 MiB VMEM) happy
    tile = min(_round_up(HW, 128), MAX_TILE)
    HWp = _round_up(HW, tile)                  # pad ragged spatial sizes

    SP = sum(s * s for s in sizes)             # 50 pooled positions total
    SPp = _round_up(SP, 8)

    # Bilinear expansion matrix: E[off_i + p*s+q, h*W+w] = Uy[h,p] * Ux[w,q]
    E_all = np.zeros((SPp, HWp), np.float32)
    off = 0
    for s in sizes:
        Uy = upsample_matrix(s, H)             # (H, s)
        Ux = upsample_matrix(s, W)             # (W, s)
        E_all[off:off + s * s, :HW] = np.einsum(
            'hp,wq->pqhw', Uy, Ux).reshape(s * s, HW)
        off += s * s
    E_all = jnp.asarray(E_all)

    # Pooled + scale-conv'd grids, packed block-diagonally so that
    # (pooled_bs @ E_all)[i*C:(i+1)*C] == bilinear_upsample(scale_i(feats)).
    pooled_bs = jnp.zeros((N, S * C, SPp), jnp.float32)
    off = 0
    for i, (s, sw) in enumerate(zip(sizes, scale_ws)):
        pooled = adaptive_avg_pool_nchw(x, s)                          # (N, C, s, s)
        pc = jnp.einsum('oc,ncpq->nopq', sw, pooled)                   # 1x1 conv, no bias
        pooled_bs = pooled_bs.at[:, i * C:(i + 1) * C,
                                 off:off + s * s].set(pc.reshape(N, C, s * s))
        off += s * s

    # weight_net as a block-diagonal matrix (one matmul covers all 4 scales).
    wn_bd = jnp.kron(jnp.eye(S, dtype=jnp.float32), wn_w)              # (S*C, S*C)
    wn_b_col = wn_b[:, None]                                           # (C, 1)

    bw_overall = bn_w[:, :C]                                           # (OUT, C)
    bw_feats = bn_w[:, C:]                                             # (OUT, C)
    bn_b_col = bn_b[:, None]                                           # (OUT, 1)

    feats_cf = x.reshape(N, C, HW)                                     # channels-major
    if HWp != HW:
        feats_cf = jnp.pad(feats_cf, ((0, 0), (0, 0), (0, HWp - HW)))

    out_full = contextual_pallas(feats_cf, pooled_bs, E_all, wn_w, wn_bd,
                                 wn_b_col, bw_overall, bw_feats, bn_b_col,
                                 tile=tile)
    out = out_full[:, :, :HW].reshape(N, OUT, H, W)                    # NCHW
    jax.block_until_ready(out)

    # ------------------ pure-JAX reference of the full forward ---------------
    def reference(xx):
        ms_list = []
        for s, sw in zip(sizes, scale_ws):
            pooled = adaptive_avg_pool_nchw(xx, s)
            pc = jnp.einsum('oc,ncpq->nopq', sw, pooled)
            Uy = jnp.asarray(upsample_matrix(s, H))
            Ux = jnp.asarray(upsample_matrix(s, W))
            ms_list.append(jnp.einsum('hp,wq,ncpq->nchw', Uy, Ux, pc))
        num, den = 0.0, 0.0
        for ms in ms_list:
            wgt = jax.nn.sigmoid(
                jnp.einsum('oc,nchw->nohw', wn_w, xx - ms)
                + wn_b[None, :, None, None])
            num = num + ms * wgt
            den = den + wgt
        cat = jnp.concatenate([num / den, xx], axis=1)
        z = jnp.einsum('oc,nchw->nohw', bn_w, cat) + bn_b[None, :, None, None]
        return jnp.maximum(z, 0.0)

    ref_out = reference(x)
    assert out.shape == (N, OUT, H, W)
    assert jnp.allclose(out, ref_out, atol=1e-4, rtol=1e-3)
    print("KERNEL_OK")
</pallas_src>

<mosaic_0001>
module attributes {stable_mosaic.version = 11 : i64} {
  func.func @_ctx_kernel(%arg0: i32, %arg1: i32, %arg2: memref<1x8x256xf32, #tpu.memory_space<vmem>>, %arg3: memref<1x32x56xf32, #tpu.memory_space<vmem>>, %arg4: memref<56x256xf32, #tpu.memory_space<vmem>>, %arg5: memref<8x8xf32, #tpu.memory_space<vmem>>, %arg6: memref<32x32xf32, #tpu.memory_space<vmem>>, %arg7: memref<8x1xf32, #tpu.memory_space<vmem>>, %arg8: memref<16x8xf32, #tpu.memory_space<vmem>>, %arg9: memref<16x8xf32, #tpu.memory_space<vmem>>, %arg10: memref<16x1xf32, #tpu.memory_space<vmem>>, %arg11: memref<1x16x256xf32, #tpu.memory_space<vmem>>) attributes {dimension_semantics = [#tpu.dimension_semantics<parallel>, #tpu.dimension_semantics<parallel>], iteration_bounds = array<i64: 2, 1>, scalar_prefetch = 0 : i64, scratch_operands = 0 : i64, tpu.core_type = #tpu.core_type<tc>, window_params = [{transform_indices = @transform_0, window_bounds = array<i64: 1, 8, 256>}, {transform_indices = @transform_1, window_bounds = array<i64: 1, 32, 56>}, {transform_indices = @transform_2, window_bounds = array<i64: 56, 256>}, {pipeline_mode = #tpu.pipeline_mode<synchronous>, transform_indices = @transform_3, window_bounds = array<i64: 8, 8>}, {pipeline_mode = #tpu.pipeline_mode<synchronous>, transform_indices = @transform_4, window_bounds = array<i64: 32, 32>}, {pipeline_mode = #tpu.pipeline_mode<synchronous>, transform_indices = @transform_5, window_bounds = array<i64: 8, 1>}, {pipeline_mode = #tpu.pipeline_mode<synchronous>, transform_indices = @transform_6, window_bounds = array<i64: 16, 8>}, {pipeline_mode = #tpu.pipeline_mode<synchronous>, transform_indices = @transform_7, window_bounds = array<i64: 16, 8>}, {pipeline_mode = #tpu.pipeline_mode<synchronous>, transform_indices = @transform_8, window_bounds = array<i64: 16, 1>}, {transform_indices = @transform_9, window_bounds = array<i64: 1, 16, 256>}]} {
    %c0 = arith.constant 0 : index
    %c0_0 = arith.constant 0 : index
    %c0_1 = arith.constant 0 : index
    %0 = vector.load %arg2[%c0, %c0_0, %c0_1] : memref<1x8x256xf32, #tpu.memory_space<vmem>>, vector<1x8x256xf32>
    %1 = vector.shape_cast %0 : vector<1x8x256xf32> to vector<8x256xf32>
    %c0_2 = arith.constant 0 : index
    %c0_3 = arith.constant 0 : index
    %c0_4 = arith.constant 0 : index
    %2 = vector.load %arg3[%c0_2, %c0_3, %c0_4] : memref<1x32x56xf32, #tpu.memory_space<vmem>>, vector<1x32x56xf32>
    %3 = vector.shape_cast %2 : vector<1x32x56xf32> to vector<32x56xf32>
    %c0_5 = arith.constant 0 : index
    %c0_6 = arith.constant 0 : index
    %4 = vector.load %arg4[%c0_5, %c0_6] : memref<56x256xf32, #tpu.memory_space<vmem>>, vector<56x256xf32>
    %cst = arith.constant dense<0.000000e+00> : vector<32x256xf32>
    %5 = tpu.matmul %3, %4, %cst {dimension_numbers = #tpu.dot_dimension_numbers<[1], [0], [0], [1], [0, 0, 1, 1], [], []>} : vector<32x56xf32>, vector<56x256xf32>, vector<32x256xf32> -> vector<32x256xf32>
    %c0_7 = arith.constant 0 : index
    %c0_8 = arith.constant 0 : index
    %6 = vector.load %arg5[%c0_7, %c0_8] : memref<8x8xf32, #tpu.memory_space<vmem>>, vector<8x8xf32>
    %cst_9 = arith.constant dense<0.000000e+00> : vector<8x256xf32>
    %7 = tpu.matmul %6, %1, %cst_9 {dimension_numbers = #tpu.dot_dimension_numbers<[1], [0], [0], [1], [0, 0, 1, 1], [], []>} : vector<8x8xf32>, vector<8x256xf32>, vector<8x256xf32> -> vector<8x256xf32>
    %c0_10 = arith.constant 0 : index
    %c0_11 = arith.constant 0 : index
    %8 = vector.load %arg7[%c0_10, %c0_11] : memref<8x1xf32, #tpu.memory_space<vmem>>, vector<8x1xf32>
    %9 = vector.broadcast %8 : vector<8x1xf32> to vector<8x256xf32>
    %10 = arith.addf %7, %9 : vector<8x256xf32>
    %c0_12 = arith.constant 0 : index
    %c0_13 = arith.constant 0 : index
    %11 = vector.load %arg6[%c0_12, %c0_13] : memref<32x32xf32, #tpu.memory_space<vmem>>, vector<32x32xf32>
    %cst_14 = arith.constant dense<0.000000e+00> : vector<32x256xf32>
    %12 = tpu.matmul %11, %5, %cst_14 {dimension_numbers = #tpu.dot_dimension_numbers<[1], [0], [0], [1], [0, 0, 1, 1], [], []>} : vector<32x32xf32>, vector<32x256xf32>, vector<32x256xf32> -> vector<32x256xf32>
    %cst_15 = arith.constant 0.000000e+00 : f32
    %13 = vector.broadcast %cst_15 : f32 to vector<8x256xf32>
    %cst_16 = arith.constant 0.000000e+00 : f32
    %14 = vector.broadcast %cst_16 : f32 to vector<8x256xf32>
    %15 = vector.extract_strided_slice %12 {offsets = [0, 0], sizes = [8, 256], strides = [1, 1]} : vector<32x256xf32> to vector<8x256xf32>
    %16 = arith.subf %10, %15 : vector<8x256xf32>
    %17 = arith.negf %16 : vector<8x256xf32>
    %18 = math.exp %17 : vector<8x256xf32>
    %cst_17 = arith.constant 1.000000e+00 : f32
    %19 = vector.broadcast %cst_17 : f32 to vector<8x256xf32>
    %20 = arith.addf %19, %18 : vector<8x256xf32>
    %21 = arith.divf %19, %20 : vector<8x256xf32>
    %22 = vector.extract_strided_slice %5 {offsets = [0, 0], sizes = [8, 256], strides = [1, 1]} : vector<32x256xf32> to vector<8x256xf32>
    %23 = arith.mulf %22, %21 : vector<8x256xf32>
    %24 = arith.addf %13, %23 : vector<8x256xf32>
    %25 = arith.addf %14, %21 : vector<8x256xf32>
    %26 = vector.extract_strided_slice %12 {offsets = [8, 0], sizes = [8, 256], strides = [1, 1]} : vector<32x256xf32> to vector<8x256xf32>
    %27 = arith.subf %10, %26 : vector<8x256xf32>
    %28 = arith.negf %27 : vector<8x256xf32>
    %29 = math.exp %28 : vector<8x256xf32>
    %cst_18 = arith.constant 1.000000e+00 : f32
    %30 = vector.broadcast %cst_18 : f32 to vector<8x256xf32>
    %31 = arith.addf %30, %29 : vector<8x256xf32>
    %32 = arith.divf %30, %31 : vector<8x256xf32>
    %33 = vector.extract_strided_slice %5 {offsets = [8, 0], sizes = [8, 256], strides = [1, 1]} : vector<32x256xf32> to vector<8x256xf32>
    %34 = arith.mulf %33, %32 : vector<8x256xf32>
    %35 = arith.addf %24, %34 : vector<8x256xf32>
    %36 = arith.addf %25, %32 : vector<8x256xf32>
    %37 = vector.extract_strided_slice %12 {offsets = [16, 0], sizes = [8, 256], strides = [1, 1]} : vector<32x256xf32> to vector<8x256xf32>
    %38 = arith.subf %10, %37 : vector<8x256xf32>
    %39 = arith.negf %38 : vector<8x256xf32>
    %40 = math.exp %39 : vector<8x256xf32>
    %cst_19 = arith.constant 1.000000e+00 : f32
    %41 = vector.broadcast %cst_19 : f32 to vector<8x256xf32>
    %42 = arith.addf %41, %40 : vector<8x256xf32>
    %43 = arith.divf %41, %42 : vector<8x256xf32>
    %44 = vector.extract_strided_slice %5 {offsets = [16, 0], sizes = [8, 256], strides = [1, 1]} : vector<32x256xf32> to vector<8x256xf32>
    %45 = arith.mulf %44, %43 : vector<8x256xf32>
    %46 = arith.addf %35, %45 : vector<8x256xf32>
    %47 = arith.addf %36, %43 : vector<8x256xf32>
    %48 = vector.extract_strided_slice %12 {offsets = [24, 0], sizes = [8, 256], strides = [1, 1]} : vector<32x256xf32> to vector<8x256xf32>
    %49 = arith.subf %10, %48 : vector<8x256xf32>
    %50 = arith.negf %49 : vector<8x256xf32>
    %51 = math.exp %50 : vector<8x256xf32>
    %cst_20 = arith.constant 1.000000e+00 : f32
    %52 = vector.broadcast %cst_20 : f32 to vector<8x256xf32>
    %53 = arith.addf %52, %51 : vector<8x256xf32>
    %54 = arith.divf %52, %53 : vector<8x256xf32>
    %55 = vector.extract_strided_slice %5 {offsets = [24, 0], sizes = [8, 256], strides = [1, 1]} : vector<32x256xf32> to vector<8x256xf32>
    %56 = arith.mulf %55, %54 : vector<8x256xf32>
    %57 = arith.addf %46, %56 : vector<8x256xf32>
    %58 = arith.addf %47, %54 : vector<8x256xf32>
    %59 = tpu.reciprocal %58 {approx = true} : vector<8x256xf32> -> vector<8x256xf32>
    %60 = arith.mulf %57, %59 : vector<8x256xf32>
    %c0_21 = arith.constant 0 : index
    %c0_22 = arith.constant 0 : index
    %61 = vector.load %arg8[%c0_21, %c0_22] : memref<16x8xf32, #tpu.memory_space<vmem>>, vector<16x8xf32>
    %cst_23 = arith.constant dense<0.000000e+00> : vector<16x256xf32>
    %62 = tpu.matmul %61, %60, %cst_23 {dimension_numbers = #tpu.dot_dimension_numbers<[1], [0], [0], [1], [0, 0, 1, 1], [], []>} : vector<16x8xf32>, vector<8x256xf32>, vector<16x256xf32> -> vector<16x256xf32>
    %c0_24 = arith.constant 0 : index
    %c0_25 = arith.constant 0 : index
    %63 = vector.load %arg9[%c0_24, %c0_25] : memref<16x8xf32, #tpu.memory_space<vmem>>, vector<16x8xf32>
    %cst_26 = arith.constant dense<0.000000e+00> : vector<16x256xf32>
    %64 = tpu.matmul %63, %1, %cst_26 {dimension_numbers = #tpu.dot_dimension_numbers<[1], [0], [0], [1], [0, 0, 1, 1], [], []>} : vector<16x8xf32>, vector<8x256xf32>, vector<16x256xf32> -> vector<16x256xf32>
    %65 = arith.addf %62, %64 : vector<16x256xf32>
    %c0_27 = arith.constant 0 : index
    %c0_28 = arith.constant 0 : index
    %66 = vector.load %arg10[%c0_27, %c0_28] : memref<16x1xf32, #tpu.memory_space<vmem>>, vector<16x1xf32>
    %67 = vector.broadcast %66 : vector<16x1xf32> to vector<16x256xf32>
    %68 = arith.addf %65, %67 : vector<16x256xf32>
    %cst_29 = arith.constant 0.000000e+00 : f32
    %69 = vector.broadcast %cst_29 : f32 to vector<16x256xf32>
    %70 = arith.maximumf %68, %69 : vector<16x256xf32>
    %c0_30 = arith.constant 0 : index
    %c0_31 = arith.constant 0 : index
    %c0_32 = arith.constant 0 : index
    %71 = vector.load %arg11[%c0_30, %c0_31, %c0_32] : memref<1x16x256xf32, #tpu.memory_space<vmem>>, vector<1x16x256xf32>
    %72 = vector.shape_cast %71 : vector<1x16x256xf32> to vector<16x256xf32>
    %73 = vector.shape_cast %70 : vector<16x256xf32> to vector<1x16x256xf32>
    tpu.vector_store %arg11[%c0_30, %c0_31, %c0_32], %73 {strides = array<i32>} : memref<1x16x256xf32, #tpu.memory_space<vmem>>, vector<1x16x256xf32>,
    return
  }
  func.func @transform_0(%arg0: i32, %arg1: i32) -> (i32, i32, i32) {
    %c0_i32 = arith.constant 0 : i32
    %c0_i32_0 = arith.constant 0 : i32
    return %arg0, %c0_i32, %arg1 : i32, i32, i32
  }
  func.func @transform_1(%arg0: i32, %arg1: i32) -> (i32, i32, i32) {
    %c0_i32 = arith.constant 0 : i32
    %c0_i32_0 = arith.constant 0 : i32
    %c0_i32_1 = arith.constant 0 : i32
    return %arg0, %c0_i32, %c0_i32_0 : i32, i32, i32
  }
  func.func @transform_2(%arg0: i32, %arg1: i32) -> (i32, i32) {
    %c0_i32 = arith.constant 0 : i32
    %c0_i32_0 = arith.constant 0 : i32
    return %c0_i32, %arg1 : i32, i32
  }
  func.func @transform_3(%arg0: i32, %arg1: i32) -> (i32, i32) {
    %c0_i32 = arith.constant 0 : i32
    %c0_i32_0 = arith.constant 0 : i32
    %c0_i32_1 = arith.constant 0 : i32
    return %c0_i32, %c0_i32_0 : i32, i32
  }
  func.func @transform_4(%arg0: i32, %arg1: i32) -> (i32, i32) {
    %c0_i32 = arith.constant 0 : i32
    %c0_i32_0 = arith.constant 0 : i32
    %c0_i32_1 = arith.constant 0 : i32
    return %c0_i32, %c0_i32_0 : i32, i32
  }
  func.func @transform_5(%arg0: i32, %arg1: i32) -> (i32, i32) {
    %c0_i32 = arith.constant 0 : i32
    %c0_i32_0 = arith.constant 0 : i32
    %c0_i32_1 = arith.constant 0 : i32
    return %c0_i32, %c0_i32_0 : i32, i32
  }
  func.func @transform_6(%arg0: i32, %arg1: i32) -> (i32, i32) {
    %c0_i32 = arith.constant 0 : i32
    %c0_i32_0 = arith.constant 0 : i32
    %c0_i32_1 = arith.constant 0 : i32
    return %c0_i32, %c0_i32_0 : i32, i32
  }
  func.func @transform_7(%arg0: i32, %arg1: i32) -> (i32, i32) {
    %c0_i32 = arith.constant 0 : i32
    %c0_i32_0 = arith.constant 0 : i32
    %c0_i32_1 = arith.constant 0 : i32
    return %c0_i32, %c0_i32_0 : i32, i32
  }
  func.func @transform_8(%arg0: i32, %arg1: i32) -> (i32, i32) {
    %c0_i32 = arith.constant 0 : i32
    %c0_i32_0 = arith.constant 0 : i32
    %c0_i32_1 = arith.constant 0 : i32
    return %c0_i32, %c0_i32_0 : i32, i32
  }
  func.func @transform_9(%arg0: i32, %arg1: i32) -> (i32, i32, i32) {
    %c0_i32 = arith.constant 0 : i32
    %c0_i32_0 = arith.constant 0 : i32
    return %arg0, %c0_i32, %arg1 : i32, i32, i32
  }
}

</mosaic_0001>

<bundles_post_ra>
// kernel: tpu_custom_call.1
= control target key start
LH: loop header
LB: loop body
LE: loop exit
PB: predicated region body
PF: predicated region fallthrough
CT: control target
= control target key end

     0   :  { %s2017_s0 = inlined_call_operand.hbm [shape: f32[2,8,256], index: 0, kind: input, shape index: {}]   ;;  %s2018_s1 = inlined_call_operand.vmem [shape: f32[2,32,56], index: 1, kind: input, shape index: {}]   ;;  %s2019_s2 = inlined_call_operand.hbm [shape: f32[56,256], index: 2, kind: input, shape index: {}]   ;;  %s2020_s3 = inlined_call_operand.hbm [shape: f32[8,8], index: 3, kind: input, shape index: {}]   ;;  %s2021_s4 = inlined_call_operand.hbm [shape: f32[32,32], index: 4, kind: input, shape index: {}]   ;;  %s2022_s5 = inlined_call_operand.vmem [shape: f32[8,1], index: 5, kind: input, shape index: {}]   ;;  %s2023_s6 = inlined_call_operand.vmem [shape: f32[16,8], index: 6, kind: input, shape index: {}]   ;;  %s2024_s7 = inlined_call_operand.vmem [shape: f32[16,8], index: 7, kind: input, shape index: {}]   ;;  %s2025_s8 = inlined_call_operand.vmem [shape: f32[16,1], index: 8, kind: input, shape index: {}]   ;;  %s2026_s9 = inlined_call_operand.hbm [shape: f32[2,16,256], index: 9, kind: output, shape index: {}]  }
   0x1   :  { %2037 = sst [smem:[#allocation17_spill]] %s2023_s6 }
   0x2   :  { %2038 = sst [smem:[#allocation18_spill]] %s2024_s7 }
   0x3   :  { %2039 = sst [smem:[#allocation19_spill]] %s2025_s8 }
   0x4   :  { %2040 = sst [smem:[#allocation20_spill]] %s2026_s9 }
   0x5   :  { %14 = vsyncpa [#allocation3], 0 }
   0x6   :  { %16 = vsyncpa [#allocation3 + $0x1], 0 }
   0x7   :  { %17 = vsyncpa [#allocation6], 0 }
   0x8   :  { %18 = vsyncpa [#allocation9], 0 }
   0x9   :  { %19 = vsyncpa [#allocation4], 0 }
   0xa   :  { %21 = vsyncpa [#allocation4 + $0x1], 0  ;;  %s1657_s30 = smov 0   ;;  %s1659_s10 = smov 0  }
   0xb   :  { %s1661_s11 = smov 0   ;;  %s1663_s12 = smov 0  }
   0xc   :  { %s1665_s13 = smov 0   ;;  %s1667_s14 = smov 0  }
   0xd LB: > { %2041 = sst [smem:[#allocation15_spill]] %s1572_s30  ;;  %s1174_s15 = sadd.s32 4294967295, %s1592_s14   ;;  %s1592_s14 = sphi %s1667_s14, %s27_s14   ;;  %s1588_s13 = sphi %s1665_s13, %s2068_s13   ;;  %s1584_s12 = sphi %s1663_s12, %s2067_s12   ;;  %s1580_s11 = sphi %s1661_s11, %s2066_s11   ;;  %s1576_s10 = sphi %s1659_s10, %s2065_s10   ;;  %s1572_s30 = sphi %s1657_s30, %s2064_s30  }
   0xe   : > { %s1175_s16 = sadd.s32 4294967294, %s1592_s14   ;;  %p61_p0 = scmp.ne.s32.totalorder %s1576_s10, %s1572_s30 }
   0xf   : > { %p1691_p1 = scmp.eq.s32.totalorder %s1174_s15, 0  ;;  %p1695_p2 = scmp.eq.s32.totalorder %s1174_s15, 1 }
  0x10   : > { %p271_p3 = scmp.eq.s32.totalorder %s1175_s16, 1  ;;  %p1176_p5 = scmp.ge.s32.totalorder %s1592_s14, 1 }
  0x11   : > { %s2042_s17 = scalar_select %p1691_p1, 1, 0 }
  0x12   : > { %s2043_s18 = scalar_select %p1695_p2, 1, 0 }
  0x13   : > { %p1701_p4 = por %p1691_p1, %p61_p0  ;;  %p1706_p6 = por %p271_p3, %p61_p0 }
  0x14   : > { %p278_p7 = scmp.lt.s32.totalorder %s1592_s14, 3  ;;  %s1594_s22 = smov [#allocation5]  }
  0x15   : > { %s2044_s19 = scalar_select %p1701_p4, 1, 0 }
  0x16   : > { %s2045_s20 = scalar_select %p1706_p6, 1, 0 }
  0x17   : > { %p1711_p8 = pnand %p1176_p5, %p278_p7  ;;  %s293_s23 = sshll.u32 %s1594_s22, 4  ;;  %s1715_s23 = int_to_ptr.vmem [resolvable:$true] %s293_s23 }
  0x18   : > { %2046 = sst [smem:[#allocation16_spill]] %s2045_s20  ;;  %s1595_s25 = smov [#allocation7]  }
  0x19   : > { %s2047_s21 = scalar_select %p1711_p8, 1, 0 }
  0x1a   : > { %p1265_p9 = pneg %p1711_p8  ;;  %s307_s26 = sshll.u32 %s1595_s25, 4  ;;  %s1726_s26 = int_to_ptr.vmem [resolvable:$true] %s307_s26 }
  0x1b   : > { %s1596_s27 = smov [#allocation8]   ;;  %s1388_s16 = scalar_lea.hbm %s2019_s2, 1792 }
  0x1c   : > { %p1722_p11 = pnand %p1265_p9, %p1691_p1  ;;  %s1728_s28 = sshll.u32 %s1596_s27, 4  ;;  %s318_s28 = int_to_ptr.vmem [resolvable:$true] %s1728_s28 }
  0x1d   : > { %p1389_p12 = scmp.ne.s32.totalorder %s2019_s2, %s1388_s16  ;;  %p1395_p5 = scmp.lt.u32.totalorder %s1388_s16, %s2019_s2 }
  0x1e   : > { %p1738_p13 = pneg %p1722_p11 }
  0x20   : > { %p1391_p0 = pnand %p1738_p13, %p1389_p12 }
  0x22   : > { %p1392_p3 = pneg %p1391_p0 }
  0x24   : > { %p1397_p7 = pnand %p1395_p5, %p1392_p3 }
  0x26   : > { %1400 = shalt.err (!%p1397_p7)
}
  0x27   : > { %s1401_s20 = scalar_lea.vmem %s1715_s23, 1792  ;;  %p1409_p1 = scmp.lt.s32.totalorder %s1715_s23, %s1715_s23 }
  0x28   : > { %p1402_p9 = scmp.ne.s32.totalorder %s1715_s23, %s1401_s20  ;;  %p1410_p4 = scmp.lt.s32.totalorder %s1401_s20, %s1401_s20 }
  0x2a   : > { %p1404_p10 = pnand %p1402_p9, %p1738_p13  ;;  %p1411_p12 = por %p1410_p4, %p1409_p1 }
  0x2c   : > { %p1405_p6 = pneg %p1404_p10 }
  0x2e   : > { %p1412_p0 = pnand %p1411_p12, %p1405_p6 }
  0x30   : > { %1415 = shalt.err (!%p1412_p0)
}
  0x31   : > { %s1597_s29 = smov 256   ;;  %s1598_s15 = smov 16  }
  0x32   : > { %1268 = dma.hbm_to_vmem [thread:$0]  (!%p1722_p11), %s2019_s2, 1792, %s1715_s23, [#allocation6], %s1597_s29, %s1597_s29, %s1598_s15  }
  0x33   : > { %s1416_s9 = scalar_lea.hbm %s2020_s3, 128 }
  0x34   : > { %p1417_p1 = scmp.ne.s32.totalorder %s2020_s3, %s1416_s9  ;;  %p1423_p10 = scmp.lt.u32.totalorder %s1416_s9, %s2020_s3 }
  0x36   : > { %p1419_p4 = pnand %p1417_p1, %p1738_p13 }
  0x38   : > { %p1420_p6 = pneg %p1419_p4 }
  0x3a   : > { %p1425_p3 = pnand %p1423_p10, %p1420_p6 }
  0x3c   : > { %1428 = shalt.err (!%p1425_p3)
}
  0x3d   : > { %s1429_s23 = scalar_lea.vmem %s1726_s26, 128  ;;  %p1437_p12 = scmp.lt.s32.totalorder %s1726_s26, %s1726_s26 }
  0x3e   : > { %p1430_p5 = scmp.ne.s32.totalorder %s1726_s26, %s1429_s23  ;;  %p1438_p0 = scmp.lt.s32.totalorder %s1429_s23, %s1429_s23 }
  0x40   : > { %p1432_p7 = pnand %p1430_p5, %p1738_p13  ;;  %p1439_p1 = por %p1438_p0, %p1437_p12 }
  0x42   : > { %p1433_p9 = pneg %p1432_p7 }
  0x44   : > { %p1440_p4 = pnand %p1439_p1, %p1433_p9 }
  0x46   : > { %1443 = shalt.err (!%p1440_p4)
}
  0x47   : > { %1271 = dma.hbm_to_vmem [thread:$0]  (!%p1722_p11), %s2020_s3, 128, %s1726_s26, [#allocation6]  }
  0x48   : > { %s1444_s29 = scalar_lea.hbm %s2021_s4, 512 }
  0x49   : > { %p1445_p6 = scmp.ne.s32.totalorder %s2021_s4, %s1444_s29  ;;  %p1451_p5 = scmp.lt.u32.totalorder %s1444_s29, %s2021_s4 }
  0x4b   : > { %p1447_p10 = pnand %p1445_p6, %p1738_p13 }
  0x4d   : > { %p1448_p3 = pneg %p1447_p10 }
  0x4f   : > { %p1453_p7 = pnand %p1451_p5, %p1448_p3 }
  0x51   : > { %1456 = shalt.err (!%p1453_p7)
}
  0x52   : > { %s1457_s27 = scalar_lea.vmem %s318_s28, 512  ;;  %p1465_p1 = scmp.lt.s32.totalorder %s318_s28, %s318_s28 }
  0x53   : > { %p1458_p9 = scmp.ne.s32.totalorder %s318_s28, %s1457_s27  ;;  %p1466_p4 = scmp.lt.s32.totalorder %s1457_s27, %s1457_s27 }
  0x55   : > { %p1460_p12 = pnand %p1458_p9, %p1738_p13  ;;  %p1467_p8 = por %p1466_p4, %p1465_p1 }
  0x57   : > { %p1461_p0 = pneg %p1460_p12 }
  0x59   : > { %p1468_p2 = pnand %p1467_p8, %p1461_p0 }
  0x5b   : > { %1471 = shalt.err (!%p1468_p2)
}
  0x5c   : > { %s1599_s26 = smov 128   ;;  %s1600_s30 = smov 8  }
  0x5d   : > { %1274 = dma.hbm_to_vmem [thread:$0]  (!%p1722_p11), %s2021_s4, 512, %s318_s28, [#allocation9], %s1599_s26, %s1599_s26, %s1600_s30  }
  0x5e   : > { %s48_s6 = sadd.s32 1, %s1580_s11  ;;  %s39_s7 = sadd.s32 1, %s1588_s13 }
  0x5f   : > { %p55_p2 = scmp.ne.s32.totalorder %s1580_s11, %s1576_s10  ;;  %p41_p8 = scmp.ge.s32.totalorder %s39_s7, 2 }
  0x60   : > { %p56_p13 = scmp.eq.s32.totalorder %s1592_s14, 0  ;;  %p2050_p6 = scmp.ne.s32.totalorder %s2043_s18, 0 }
  0x61   : > { %p1286_p3 = scmp.lt.s32.totalorder %s1592_s14, 2  ;;  %s2070_s7 = smov (%p41_p8, %s39_s7), 0 }
  0x62   : > { %p1808_p10 = por %p2050_p6, %p55_p2  ;;  %p57_p5 = por %p56_p13, %p55_p2 }
  0x63   : > { %s343_s24 = sand.u32 1, %s1580_s11   ;;  %s43_s9 = ssub.s32 %s1588_s13, %s2070_s7 }
  0x64   : > { %p46_p7 = scmp.eq.s32.totalorder %s43_s9, 0  ;;  %s1181_s28 = sshll.u32 %s343_s24, 4 }
  0x65   : > { %s1218_s29 = sshll.u32 %s1588_s13, 8  ;;  %s347_s25 = scalar_lea.vmem [#allocation2], %s1181_s28 }
  0x66   : > { %s1820_s15 = scalar_select %p46_p7, %s1580_s11, %s48_s6  }
  0x67   : > { %s1825_s18 = scalar_lea.hbm %s2017_s0, %s1218_s29  ;;  %s357_s27 = sshll.u32 %s347_s25, 4  ;;  %s1827_s27 = int_to_ptr.vmem [resolvable:$true] %s357_s27 }
  0x68   : > { %p1831_p11 = pnand %p1286_p3, %p57_p5  ;;  %s344_s30 = scalar_lea.sflag [#allocation3], %s343_s24 }
  0x69   : > { %s1472_s20 = scalar_lea.hbm %s1825_s18, 256  ;;  %s1477_s9 = scalar_lea.hbm %s2017_s0, 512 }
  0x6a   : > { %p1473_p9 = scmp.ne.s32.totalorder %s1825_s18, %s1472_s20  ;;  %p1474_p12 = pneg %p1831_p11 }
  0x6b   : > { %p1478_p4 = scmp.lt.u32.totalorder %s1825_s18, %s2017_s0  ;;  %p1479_p2 = scmp.lt.u32.totalorder %s1477_s9, %s1472_s20 }
  0x6c   : > { %p1475_p0 = pnand %p1474_p12, %p1473_p9  ;;  %p1481_p13 = scmp.lt.u32.totalorder %s1472_s20, %s1825_s18 }
  0x6d   : > { %p1480_p8 = por %p1479_p2, %p1478_p4 }
  0x6e   : > { %p1476_p1 = pneg %p1475_p0 }
  0x6f   : > { %p1482_p6 = por %p1481_p13, %p1480_p8 }
  0x71   : > { %p1483_p3 = pnand %p1482_p6, %p1476_p1 }
  0x73   : > { %1486 = shalt.err (!%p1483_p3)
}
  0x74   : > { %s1487_s24 = scalar_lea.vmem %s1827_s27, 256  ;;  %s1601_s16 = smov [#allocation2]  }
  0x75   : > { %p1488_p5 = scmp.ne.s32.totalorder %s1827_s27, %s1487_s24  ;;  %s1492_s22 = sshll.u32 %s1601_s16, 4  ;;  %s1493_s22 = int_to_ptr.vmem [resolvable:$false] %s1492_s22 }
  0x76   : > { %s1494_s25 = scalar_lea.vmem %s1493_s22, 512  ;;  %p1495_p0 = scmp.lt.s32.totalorder %s1827_s27, %s1493_s22 }
  0x77   : > { %p1490_p7 = pnand %p1488_p5, %p1474_p12  ;;  %p1496_p4 = scmp.lt.s32.totalorder %s1494_s25, %s1487_s24 }
  0x79   : > { %p1491_p9 = pneg %p1490_p7  ;;  %p1497_p2 = por %p1496_p4, %p1495_p0 }
  0x7b   : > { %p1498_p8 = pnand %p1497_p2, %p1491_p9 }
  0x7d   : > { %1501 = shalt.err (!%p1498_p8)
}
  0x7e   : > { %1278 = dma.hbm_to_vmem [thread:$0]  (!%p1831_p11), %s1825_s18, 256, %s1827_s27, %s344_s30  }
  0x7f   : > { %p2053_p1 = scmp.ne.s32.totalorder %s2047_s21, 0 }
  0x80   : > { %s1863_s20 = sand.u32 (!%p2053_p1), 1, %s1576_s10   ;;  %p2054_p12 = scmp.ne.s32.totalorder (!%p2053_p1), %s2044_s19, 0 }
  0x81   : > { %374 = sbr.rel (%p2053_p1) target bundleno = 892 (0x37c), region = 56  ;;  %s1185_s23 = sshll.u32 (!%p2053_p1), %s1863_s20, 4 }
  0x82   : > { %s377_s6 = scalar_lea.sflag (!%p2053_p1), [#allocation3], %s1863_s20  ;;  %s1867_s9 = scalar_lea.vmem (!%p2053_p1), [#allocation2], %s1185_s23 }
  0x88   : > { %1555 = dma.done.wait (%p2054_p12), %s377_s6, 256  }
  0x89   : > { %1557 = vsyncadd (%p2054_p12), %s377_s6, 4294967040  ;;  %p2055_p11 = scmp.ne.s32.totalorder %s2042_s17, 0 }
  0x8b   : > { %1559 = dma.done.wait (%p2055_p11), [#allocation6], 1920  }
  0x8c   : > { %1561 = vsyncadd (%p2055_p11), [#allocation6], 4294965376 }
  0x8d   : > { %1563 = dma.done.wait (%p2055_p11), [#allocation9], 512  }
  0x8e   : > { %1565 = vsyncadd (%p2055_p11), [#allocation9], 4294966784  ;;  %v1602_v0 = vmov 0.0   ;;  %v447_v1 = vld [vmem:[#allocation5 + $0x8] sm:$0xff]  ;;  %v449_v2 = vld [vmem:[#allocation5 + $0x18] sm:$0xff]  ;;  %p433_p13 = scmp.lt.s32.totalorder %s1584_s12, 1 }
  0x8f   : > { %537 = vmatprep.mubr.f32.mxu0 %v1602_v0  ;;  %637 = vmatprep.mubr.f32.mxu1 %v1602_v0  ;;  %v446_v3 = vld [vmem:[#allocation5] sm:$0xff]  ;;  %v1221_v4 = vpack.c.bf16 %v449_v2, %v447_v1  ;;  %v448_v5 = vld [vmem:[#allocation5 + $0x10] sm:$0xff]  ;;  %v451_v6 = vld [vmem:[#allocation5 + $0x28] sm:$0xff]  ;;  %vm460_vm0 = vcmask 457728   ;;  %vm569_vm1 = vcmask 64512   ;;  %v1603_v29 = vmov 0  }
  0x90   : > { %v453_v7 = vld [vmem:[#allocation5 + $0x38] sm:$0xff]  ;;  %v1223_v8 = vpack.c.bf16 %v448_v5, %v446_v3  ;;  %v450_v10 = vld [vmem:[#allocation5 + $0x20] sm:$0xff]  ;;  %v452_v11 = vld [vmem:[#allocation5 + $0x30] sm:$0xff]  ;;  %s434_s17 = scalar_select %p433_p13, %s1584_s12, 1  ;;  %1350 = vset.pattern.permute.xlu0 %v1603_v29  ;;  %1351 = vset.pattern.permute.xlu1 %v1603_v29  ;;  %vm648_vm2 = vcmask 261120  }
  0x91   : > { %v1225_v9 = vpack.c.bf16 %v453_v7, %v451_v6  ;;  %v455_v12 = vld [vmem:[#allocation5 + $0x48] sm:$0xff]  ;;  %1222 = vmatprep.subr.bf16.mxu0 %v1221_v4  ;;  %v457_v13 = vld [vmem:[#allocation5 + $0x58] sm:$0xff]  ;;  %v1227_v14 = vpack.c.bf16 %v452_v11, %v450_v10  ;;  %v454_v16 = vld [vmem:[#allocation5 + $0x40] sm:$0xff]  ;;  %s2056_s24 = sld [smem:[#allocation19_spill]]  ;;  %s2057_s25 = sld [smem:[#allocation18_spill]] }
  0x92   : > { %1224 = vmatpush1.bf16.msra.mxu0 %v1223_v8  ;;  %v1229_v15 = vpack.c.bf16 %v457_v13, %v455_v12  ;;  %v456_v17 = vld [vmem:[#allocation5 + $0x50] sm:$0xff]  ;;  %s1219_s19 = sshll.u32 %s434_s17, 5  ;;  %v459_v19 = vld [vmem:[#allocation5 + $0x68] sm:$0xff]  ;;  %v458_v20 = vld [vmem:[#allocation5 + $0x60] sm:$0xff]  ;;  %s2058_s18 = sld [smem:[#allocation17_spill]] }
  0x93   : > { %1226 = vmatprep.subr.bf16.mxu0 %v1225_v9  ;;  %v1231_v18 = vpack.c.bf16 %v456_v17, %v454_v16  ;;  %s437_s27 = scalar_lea.vmem %s2018_s1, %s1219_s19  ;;  %v441_v25 = vld [vmem:[%s1867_s9 + $0x8] sm:$0xff]  ;;  %v440_v26 = vld [vmem:[%s1867_s9] sm:$0xff]  ;;  %s1189_s30 = sshll.u32 %s1863_s20, 5 }
  0x94   : > { %v442_v21 = vld [vmem:[%s437_s27] sm:$0xff]  ;;  %v443_v22 = vld [vmem:[%s437_s27 + $0x8] sm:$0xff]  ;;  %v444_v23 = vld [vmem:[%s437_s27 + $0x10] sm:$0xff]  ;;  %573 = vmatprep.subr.mxu1 %v441_v25  ;;  %s431_s28 = scalar_lea.vmem [#allocation10], %s1189_s30  ;;  %s1220_s16 = sshll.u32 %s1584_s12, 9 }
  0x95   : > { %v445_v24 = vld [vmem:[%s437_s27 + $0x18] sm:$0xff]  ;;  %574 = vmatpush1.msra.mxu1 %v440_v26  ;;  %v562_v27 = vld [vmem:[#allocation7] sm:$0xff]  ;;  %v563_v28 = vld [vmem:[%s2022_s5] sm:$0xff]  ;;  %s1044_s29 = sshll.u32 %s431_s28, 4  ;;  %s2059_s6 = sld [smem:[#allocation20_spill]]  ;;  %s1963_s29 = int_to_ptr.vmem [resolvable:$true] %s1044_s29 }
  0x96   : > { %1228 = vmatpush1.bf16.msra.mxu0 %v1227_v14  ;;  %1196 = vmatmul.mubr.msk.f32.vlgmr.msra.gmra.mrb[0].mxu1 %vm569_vm1, %v562_v27  ;;  %v644_v43 = vld [vmem:[#allocation8] sm:$0xff]  ;;  %v645_v44 = vld [vmem:[#allocation8 + $0x8] sm:$0xff]  ;;  %v646_v45 = vld [vmem:[#allocation8 + $0x10] sm:$0xff]  ;;  %s1029_s12 = scalar_lea.sflag [#allocation4], %s1863_s20  ;;  %s1502_s17 = scalar_lea.vmem %s1963_s29, 512 }
  0x97   : > { %1230 = vmatprep.subr.bf16.mxu0 %v1229_v15  ;;  %731 = vmatprep.mubr.f32.mxu1 %v1602_v0  ;;  %v1004_v30 = vld [vmem:[%s2056_s24] sm:$0xff]  ;;  %v647_v46 = vld [vmem:[#allocation8 + $0x18] sm:$0xff]  ;;  %v837_v50 = vld [vmem:[%s2057_s25 + $0x8] sm:$0xff]  ;;  %p1503_p6 = scmp.ne.s32.totalorder %s1963_s29, %s1502_s17  ;;  %s1604_s19 = smov [#allocation10]  }
  0x98   : > { %566 = vperm.xlu0 %1350, %v563_v28   ;;  %v836_v49 = vld [vmem:[%s2057_s25] sm:$0xff]  ;;  %v1005_v51 = vld [vmem:[%s2056_s24 + $0x8] sm:$0xff]  ;;  %s1506_s21 = sshll.u32 %s1604_s19, 4  ;;  %s1507_s21 = int_to_ptr.vmem [resolvable:$false] %s1506_s21 }
  0x99   : > { %1013 = vperm.xlu1 %1351, %v1005_v51   ;;  %p1504_p3 = pnand %p1503_p6, %p1808_p10  ;;  %s1508_s27 = scalar_lea.vmem %s1507_s21, 1024 }
  0x9a   : > { %1232 = vmatpush1.bf16.msra.mxu0 %v1231_v18  ;;  %p1509_p7 = scmp.lt.s32.totalorder %s1963_s29, %s1507_s21  ;;  %p1510_p9 = scmp.lt.s32.totalorder %s1508_s27, %s1502_s17 }
  0x9b   : > { %485 = vmatprep.subr.mxu0 %v459_v19  ;;  %s1968_s9 = scalar_lea.hbm %s2059_s6, %s1220_s16  ;;  %p1505_p5 = pneg %p1504_p3 }
  0x9c   : > { %1008 = vperm.xlu0 %1350, %v1004_v30   ;;  %p1511_p0 = por %p1510_p9, %p1509_p7 }
  0x9e   : > { %486 = vmatpush1.msra.mxu0 %v458_v20  ;;  %p1512_p4 = pnand %p1511_p0, %p1505_p5 }
  0x9f   : > { %1192 = vmatmul.mubr.msk.f32.vlgmr.msra.gmra.mrb[0].mxu0 %vm460_vm0, %v442_v21 }
  0xa0   : > { %543 = vmatprep.mubr.f32.mxu0 %v1602_v0 }
  0xa3   : > { %1193 = vmatmul.mubr.msk.f32.gmra.mrb[2].mxu0 %vm460_vm0, %v443_v22 }
  0xa4   : > { %549 = vmatprep.mubr.f32.mxu0 %v1602_v0 }
  0xa7   : > { %1194 = vmatmul.mubr.msk.f32.gmra.mrb[4].mxu0 %vm460_vm0, %v444_v23 }
  0xa8   : > { %555 = vmatprep.mubr.f32.mxu0 %v1602_v0 }
  0xab   : > { %1195 = vmatmul.mubr.msk.f32.gmra.mrb[6].mxu0 %vm460_vm0, %v445_v24 }
  0xac   : > { %725 = vmatprep.mubr.f32.mxu0 %v1602_v0 }
 0x117   : > { %v567_v52 = vpop.permute.xlu0 %566 }
 0x169   : > { %v639_v47 = vpop.f32.mrb[0].mxu1 }
 0x16a   : > { %v641_v48 = vpop.f32.mrb[1].mxu1  ;;  %v640_v53 = vadd.f32 %v639_v47, %v567_v52 }
 0x16b   : > { %v642_v54 = vadd.f32 %v641_v48, %v567_v52 }
 0x172   : > { %v1904_v31 = vpop.f32.mrb[0].mxu0 }
 0x173   : > { %v1906_v32 = vpop.f32.mrb[1].mxu0 }
 0x176   : > { %v1908_v33 = vpop.f32.mrb[2].mxu0 }
 0x177   : > { %v1235_v34 = vpack.c.bf16 %v1908_v33, %v1904_v31  ;;  %v1912_v35 = vpop.f32.mrb[3].mxu0 }
 0x178   : > { %v1233_v36 = vpack.c.bf16 %v1912_v35, %v1906_v32 }
 0x17a   : > { %v1916_v37 = vpop.f32.mrb[4].mxu0  ;;  %1234 = vmatprep.subr.bf16.mxu0 %v1233_v36  ;;  %1241 = vmatprep.subr.bf16.mxu1 %v1233_v36 }
 0x17b   : > { %v1918_v38 = vpop.f32.mrb[5].mxu0  ;;  %1236 = vmatpush1.bf16.msra.mxu0 %v1235_v34  ;;  %1243 = vmatpush1.bf16.msra.mxu1 %v1235_v34 }
 0x17e   : > { %v1920_v39 = vpop.f32.mrb[6].mxu0 }
 0x17f   : > { %v1239_v40 = vpack.c.bf16 %v1920_v39, %v1916_v37  ;;  %v1924_v41 = vpop.f32.mrb[7].mxu0 }
 0x180   : > { %v1237_v42 = vpack.c.bf16 %v1924_v41, %v1918_v38 }
 0x182   : > { %1238 = vmatprep.subr.bf16.mxu0 %v1237_v42  ;;  %1242 = vmatprep.subr.bf16.mxu1 %v1237_v42 }
 0x183   : > { %1240 = vmatpush1.bf16.msra.mxu0 %v1239_v40  ;;  %1244 = vmatpush1.bf16.msra.mxu1 %v1239_v40 }
 0x184   : > { %844 = vmatprep.subr.mxu1 %v441_v25 }
 0x186   : > { %1197 = vmatmul.mubr.msk.f32.vlgmr.msra.gmra.mrb[8].mxu0 %vm648_vm2, %v644_v43  ;;  %1198 = vmatmul.mubr.msk.f32.vlgmr.msra.gmra.mrb[2].mxu1 %vm648_vm2, %v645_v44 }
 0x187   : > { %737 = vmatprep.mubr.f32.mxu1 %v1602_v0  ;;  %845 = vmatpush1.msra.mxu1 %v440_v26 }
 0x18a   : > { %1199 = vmatmul.mubr.msk.f32.gmra.mrb[4].mxu1 %vm648_vm2, %v646_v45 }
 0x18b   : > { %743 = vmatprep.mubr.f32.mxu1 %v1602_v0 }
 0x18e   : > { %1200 = vmatmul.mubr.msk.f32.gmra.mrb[6].mxu1 %vm648_vm2, %v647_v46 }
 0x18f   : > { %908 = vmatprep.mubr.f32.mxu1 %v1602_v0 }
 0x192   : > { %1209 = vmatmul.mubr.msk.f32.vlgmr.msra.gmra.mrb[8].mxu1 %vm569_vm1, %v836_v49 }
 0x193   : > { %914 = vmatprep.mubr.f32.mxu1 %v1602_v0 }
 0x196   : > { %1210 = vmatmul.mubr.msk.f32.gmra.mrb[10].mxu1 %vm569_vm1, %v837_v50 }
 0x197   : > { %991 = vmatprep.mubr.f32.mxu1 %v1602_v0 }
 0x259   : > { %v727_v55 = vpop.f32.mrb[8].mxu0  ;;  %v733_v56 = vpop.f32.mrb[2].mxu1 }
 0x25a   : > { %v750_v57 = vsub.f32 %v640_v53, %v727_v55  ;;  %v770_v58 = vsub.f32 %v640_v53, %v733_v56  ;;  %v729_v59 = vpop.f32.mrb[9].mxu0  ;;  %v735_v60 = vpop.f32.mrb[3].mxu1 }
 0x25b   : > { %v751_v61 = vsub.f32 %v642_v54, %v729_v59  ;;  %v771_v62 = vsub.f32 %v642_v54, %v735_v60 }
 0x25c   : > { %v1201_v63 = vmul.f32 -1.442695, %v750_v57  ;;  %v1203_v1 = vmul.f32 -1.442695, %v770_v58 }
 0x25d   : > { %v1202_v2 = vmul.f32 -1.442695, %v751_v61  ;;  %v1204_v3 = vmul.f32 -1.442695, %v771_v62  ;;  %v739_v4 = vpop.f32.mrb[4].mxu1 }
 0x25e   : > { %1352 = vpow2.f32 %v1201_v63  ;;  %v790_v5 = vsub.f32 %v640_v53, %v739_v4  ;;  %v741_v6 = vpop.f32.mrb[5].mxu1 }
 0x25f   : > { %1354 = vpow2.f32 %v1203_v1  ;;  %v791_v7 = vsub.f32 %v642_v54, %v741_v6 }
 0x260   : > { %1356 = vpow2.f32 %v1202_v2  ;;  %v1205_v8 = vmul.f32 -1.442695, %v790_v5 }
 0x261   : > { %1358 = vpow2.f32 %v1204_v3  ;;  %v1206_v9 = vmul.f32 -1.442695, %v791_v7  ;;  %v745_v10 = vpop.f32.mrb[6].mxu1 }
 0x262   : > { %1360 = vpow2.f32 %v1205_v8  ;;  %v810_v11 = vsub.f32 %v640_v53, %v745_v10  ;;  %v747_v12 = vpop.f32.mrb[7].mxu1  ;;  %v1014_v8 = vpop.permute.xlu1 %1013 }
 0x263   : > { %1362 = vpow2.f32 %v1206_v9  ;;  %v811_v13 = vsub.f32 %v642_v54, %v747_v12 }
 0x264   : > { %v1207_v14 = vmul.f32 -1.442695, %v810_v11 }
 0x265   : > { %v1208_v15 = vmul.f32 -1.442695, %v811_v13 }
 0x266   : > { %1364 = vpow2.f32 %v1207_v14 }
 0x267   : > { %1366 = vpow2.f32 %v1208_v15 }
 0x268   : > { %v1353_v16 = vpop.eup %1352 }
 0x269   : > { %v1355_v17 = vpop.eup %1354  ;;  %v758_v18 = vadd.f32 1.0, %v1353_v16 }
 0x26a   : > { %v1357_v19 = vpop.eup %1356  ;;  %v778_v20 = vadd.f32 1.0, %v1355_v17 }
 0x26b   : > { %v1359_v21 = vpop.eup %1358  ;;  %1368 = vrcp.f32 %v758_v18  ;;  %v759_v22 = vadd.f32 1.0, %v1357_v19 }
 0x26c   : > { %v1361_v23 = vpop.eup %1360  ;;  %1370 = vrcp.f32 %v778_v20  ;;  %v779_v24 = vadd.f32 1.0, %v1359_v21 }
 0x26d   : > { %v1363_v25 = vpop.eup %1362  ;;  %1372 = vrcp.f32 %v759_v22  ;;  %v798_v26 = vadd.f32 1.0, %v1361_v23 }
 0x26e   : > { %1374 = vrcp.f32 %v779_v24  ;;  %v799_v27 = vadd.f32 1.0, %v1363_v25 }
 0x26f   : > { %1376 = vrcp.f32 %v798_v26 }
 0x270   : > { %v1365_v28 = vpop.eup %1364  ;;  %1378 = vrcp.f32 %v799_v27 }
 0x271   : > { %v1367_v29 = vpop.eup %1366  ;;  %v818_v30 = vadd.f32 1.0, %v1365_v28 }
 0x272   : > { %v819_v34 = vadd.f32 1.0, %v1367_v29 }
 0x273   : > { %1380 = vrcp.f32 %v818_v30 }
 0x274   : > { %1382 = vrcp.f32 %v819_v34 }
 0x275   : > { %v1369_v36 = vpop.eup %1368 }
 0x276   : > { %v1371_v40 = vpop.eup %1370  ;;  %v764_v42 = vmul.f32 %v1369_v36, %v1904_v31 }
 0x277   : > { %v1373_v43 = vpop.eup %1372  ;;  %v788_v44 = vadd.f32 %v1371_v40, %v1369_v36  ;;  %v784_v45 = vmul.f32 %v1371_v40, %v1908_v33 }
 0x278   : > { %v1375_v46 = vpop.eup %1374  ;;  %v765_v47 = vmul.f32 %v1373_v43, %v1906_v32 }
 0x279   : > { %v1377_v48 = vpop.eup %1376  ;;  %v789_v49 = vadd.f32 %v1375_v46, %v1373_v43  ;;  %v785_v50 = vmul.f32 %v1375_v46, %v1912_v35  ;;  %v786_v51 = vadd.f32 %v784_v45, %v764_v42 }
 0x27a   : > { %v1379_v52 = vpop.eup %1378  ;;  %v808_v53 = vadd.f32 %v1377_v48, %v788_v44  ;;  %v804_v54 = vmul.f32 %v1377_v48, %v1916_v37 }
 0x27b   : > { %v809_v55 = vadd.f32 %v1379_v52, %v789_v49  ;;  %v787_v56 = vadd.f32 %v785_v50, %v765_v47  ;;  %v805_v31 = vmul.f32 %v1379_v52, %v1918_v38  ;;  %v834_v38 = vld [vmem:[%s2058_s18] sm:$0xff] }
 0x27c   : > { %v806_v57 = vadd.f32 %v804_v54, %v786_v51 }
 0x27d   : > { %v1381_v58 = vpop.eup %1380  ;;  %v807_v59 = vadd.f32 %v805_v31, %v787_v56 }
 0x27e   : > { %v1383_v33 = vpop.eup %1382  ;;  %v828_v60 = vadd.f32 %v1381_v58, %v808_v53  ;;  %v824_v32 = vmul.f32 %v1381_v58, %v1920_v39  ;;  %v835_v39 = vld [vmem:[%s2058_s18 + $0x8] sm:$0xff] }
 0x27f   : > { %v825_v61 = vmul.f32 %v1383_v33, %v1924_v41  ;;  %v829_v62 = vadd.f32 %v1383_v33, %v809_v55  ;;  %v1009_v41 = vpop.permute.xlu0 %1008 }
 0x280   : > { %1384 = vrcp.f32 %v828_v60  ;;  %v826_v35 = vadd.f32 %v824_v32, %v806_v57 }
 0x281   : > { %v827_v63 = vadd.f32 %v825_v61, %v807_v59  ;;  %1386 = vrcp.f32 %v829_v62 }
 0x28a   : > { %v1385_v37 = vpop.eup %1384 }
 0x28b   : > { %v1387_v1 = vpop.eup %1386  ;;  %v832_v2 = vmul.f32 %v1385_v37, %v826_v35 }
 0x28c   : > { %v833_v3 = vmul.f32 %v1387_v1, %v827_v63 }
 0x28e   : > { %927 = vmatprep.subr.mxu1 %v833_v3 }
 0x28f   : > { %928 = vmatpush1.msra.mxu1 %v832_v2 }
 0x290   : > { %1211 = vmatmul.mubr.msk.f32.vlgmr.msra.gmra.mrb[8].mxu1 %vm569_vm1, %v834_v38 }
 0x291   : > { %997 = vmatprep.mubr.f32.mxu1 %v1602_v0 }
 0x294   : > { %1212 = vmatmul.mubr.msk.f32.gmra.mrb[10].mxu1 %vm569_vm1, %v835_v39 }
 0x363   : > { %v993_v4 = vpop.f32.mrb[8].mxu1 }
 0x364   : > { %v1016_v5 = vadd.f32 %v1009_v41, %v993_v4  ;;  %v995_v6 = vpop.f32.mrb[9].mxu1 }
 0x365   : > { %v1017_v7 = vadd.f32 %v1009_v41, %v995_v6 }
 0x366   : > { %v1020_v9 = vmax.f32 %v1016_v5, 0.0 }
 0x367   : > { %v1021_v10 = vmax.f32 %v1017_v7, 0.0  ;;  %v999_v11 = vpop.f32.mrb[10].mxu1 }
 0x368   : > { %1024 = vst [vmem:[%s431_s28] sm:$0xff] %v1020_v9  ;;  %v1018_v0 = vadd.f32 %v1014_v8, %v999_v11  ;;  %v1001_v12 = vpop.f32.mrb[11].mxu1 }
 0x369   : > { %1025 = vst [vmem:[%s431_s28 + $0x8] sm:$0xff] %v1021_v10  ;;  %v1019_v13 = vadd.f32 %v1014_v8, %v1001_v12 }
 0x36a   : > { %v1022_v14 = vmax.f32 %v1018_v0, 0.0 }
 0x36b   : > { %v1023_v15 = vmax.f32 %v1019_v13, 0.0 }
 0x36c   : > { %1026 = vst [vmem:[%s431_s28 + $0x10] sm:$0xff] %v1022_v14 }
 0x36d   : > { %1027 = vst [vmem:[%s431_s28 + $0x18] sm:$0xff] %v1023_v15 }
 0x36e   : > { %1515 = shalt.err (!%p1512_p4)
}
 0x36f   : > { %s1516_s26 = scalar_lea.hbm %s1968_s9, 512  ;;  %s1520_s16 = scalar_lea.hbm %s2059_s6, 1024 }
 0x370   : > { %p1517_p2 = scmp.ne.s32.totalorder %s1968_s9, %s1516_s26  ;;  %p1521_p12 = scmp.lt.u32.totalorder %s1968_s9, %s2059_s6 }
 0x371   : > { %p1522_p11 = scmp.lt.u32.totalorder %s1520_s16, %s1516_s26  ;;  %p1524_p6 = scmp.lt.u32.totalorder %s1516_s26, %s1968_s9 }
 0x372   : > { %p1518_p8 = pnand %p1517_p2, %p1808_p10 }
 0x373   : > { %p1523_p13 = por %p1522_p11, %p1521_p12 }
 0x374   : > { %p1519_p1 = pneg %p1518_p8 }
 0x375   : > { %p1525_p3 = por %p1524_p6, %p1523_p13 }
 0x377   : > { %p1526_p5 = pnand %p1525_p3, %p1519_p1 }
 0x379   : > { %1529 = shalt.err (!%p1526_p5)
}
 0x37a   : > { %s1605_s17 = smov 256   ;;  %s1606_s19 = smov 16  }
 0x37b   : > { %1263 = dma.vmem_to_hbm [thread:$0]  (%p1808_p10), %s1963_s29, 512, %s1968_s9, %s1029_s12, %s1605_s17, %s1605_s17, %s1606_s19  }
 0x37c PF: > { %s2060_s21 = sld [smem:[#allocation15_spill]]  ;;  %s2061_s27 = sld [smem:[#allocation16_spill]] }
 0x37d   : > { %p2063_p9 = scmp.ge.s32.totalorder %s1592_s14, 2 }
 0x382   : > { %s1059_s30 = sand.u32 1, %s2060_s21   ;;  %p2062_p7 = scmp.ne.s32.totalorder %s2061_s27, 0 }
 0x383   : > { %s1060_s26 = scalar_lea.sflag [#allocation4], %s1059_s30 }
 0x384   : > { %p1280_p0 = pnand %p2063_p9, %p2062_p7 }
 0x386   : > { %1567 = dma.done.wait (!%p1280_p0), %s1060_s26, 512  }
 0x387   : > { %1569 = vsyncadd (!%p1280_p0), %s1060_s26, 4294966784  ;;  %s27_s14 = sadd.s32 1, %s1592_s14   ;;  %s2064_s30 = smov %s1576_s10 }
 0x388   : > { %p24_p4 = scmp.ge.s32.totalorder %s27_s14, 4   ;;  %s2065_s10 = smov %s1580_s11 }
 0x389   : > { %s2066_s11 = smov %s1820_s15  ;;  %s2067_s12 = smov %s1588_s13 }
 0x38a   : > { %s2068_s13 = smov %s2070_s7  ;;  %26 = sbr.rel (!%p24_p4) target bundleno = 13 (0xd), region = 117 }
 0x391   :  { %1065 = vsyncpa [#allocation3], 1 }
 0x392   :  { %1067 = vsyncpa [#allocation3 + $0x1], 1 }
 0x393   :  { %1068 = vsyncpa [#allocation6], 1 }
 0x394   :  { %1069 = vsyncpa [#allocation9], 1 }
 0x395   :  { %1070 = vsyncpa [#allocation4], 1 }
 0x396   :  { %1072 = vsyncpa [#allocation4 + $0x1], 1 }

</bundles_post_ra>
